<compile_context>
chip_gen: v7x
topology: tpu7x:2x2x1
jax: 0.10.0
libtpu: 0.0.40
codegen_flags: <defaults>
</compile_context>

<pallas_src>
import jax
import jax.numpy as jnp
from jax.experimental import pallas as pl
from jax.experimental.pallas import tpu as pltpu


def _copy_kernel(x_ref, o_ref):
    # Pure lane-dense 2D tile copy (unmasked full-lane vst when the lane block
    # is a multiple of 128 / full extent).
    o_ref[...] = x_ref[...]


def _sublane_align(itemsize):
    # 8 for 32-bit, 16 for bf16, 32 for int8/fp8 (packed dtypes pack sublanes).
    return 8 * max(1, 4 // itemsize)


def _choose_slab(N, K):
    """Return (rows, L): a lane-dense, order-preserving 2D factorization of the
    flat (N*K,) buffer. Prefers the natural (N, K) view when K is already a
    multiple of 128 (reshape becomes a no-op)."""
    if K % 128 == 0:
        return N, K
    total = N * K
    if total % 128 == 0:
        L = 128
        for cand in (8192, 4096, 2048, 1024, 512, 256):
            if total % cand == 0:
                L = cand
                break
        return total // L, L
    # No 128-divisible factorization: keep (N, K); edge lanes get masked stores.
    return N, K


def _block_dims(rows, cols, itemsize, target_bytes):
    """Pick (br, bc) obeying the (sublane, 128) rule with br*bc*itemsize kept
    around target_bytes. Each dim is either the full extent or an aligned
    multiple."""
    sub_align = _sublane_align(itemsize)
    lane_align = 128
    target_elems = max(1, target_bytes // itemsize)

    # Lane (last) dim: full extent if a sub_align-row slab of it fits the
    # budget, else the largest 128-multiple that does.
    if cols <= lane_align or cols * sub_align <= target_elems:
        bc = cols
    else:
        bc = (target_elems // sub_align // lane_align) * lane_align
        bc = max(lane_align, min(bc, (cols // lane_align) * lane_align))

    # Sublane dim: spend the remaining byte budget on rows.
    max_rows = max(1, target_elems // max(bc, 1))
    if rows <= max(max_rows, sub_align):
        br = rows
    else:
        br = max(sub_align, (max_rows // sub_align) * sub_align)
    return br, bc


def unflatten(x, C, H, W, *, block_bytes=None):
    """Reshape (N, C*H*W) -> (N, C, H, W) via a tiled, lane-dense Pallas copy."""
    N, K = x.shape
    assert K == C * H * W, "flattened dim must equal C*H*W"
    itemsize = jnp.dtype(x.dtype).itemsize

    # Generation-aware VMEM budget: query physical VMEM (64 MiB on v7x,
    # 128 MiB on v5e/v6e), keep ~25% headroom, and pass it explicitly so the
    # scoped default (16 MiB v5e / 32 MiB v6e,v7x) does not reject the tiles.
    try:
        vmem_cap = pltpu.get_tpu_info().vmem_capacity_bytes
    except Exception:
        vmem_cap = 64 << 20  # conservative fallback (v7x per-core VMEM)
    vmem_limit = min((vmem_cap * 3) // 4, 96 << 20)
    if block_bytes is None:
        # Live bytes ~= 4x block (input + output, each double-buffered).
        block_bytes = min(8 << 20, vmem_limit // 6)

    # Lane-dense slab view of the flat buffer (order-preserving; no-op when
    # K is already a multiple of 128).
    rows, L = _choose_slab(N, K)
    x2d = jnp.reshape(x, (rows, L))

    br, bl = _block_dims(rows, L, itemsize, block_bytes)
    grid = (pl.cdiv(rows, br), pl.cdiv(L, bl))

    y2d = pl.pallas_call(
        _copy_kernel,
        out_shape=jax.ShapeDtypeStruct((rows, L), x.dtype),
        grid=grid,
        in_specs=[pl.BlockSpec((br, bl), lambda i, j: (i, j))],
        out_specs=pl.BlockSpec((br, bl), lambda i, j: (i, j)),
        compiler_params=pltpu.CompilerParams(
            dimension_semantics=("parallel", "parallel"),
            vmem_limit_bytes=vmem_limit,
        ),
    )(x2d)

    # Element order is identical, so this final reshape is pure layout plumbing.
    return jnp.reshape(y2d, (N, C, H, W))


if __name__ == "__main__":
    key = jax.random.PRNGKey(0)

    # 1) Small shape consistent with the module (K not a multiple of 128 ->
    #    exercises the lane-dense slab re-factorization path).
    N, C, H, W = 2, 4, 4, 4
    x = jax.random.normal(key, (N, C * H * W), dtype=jnp.float32)
    y = jax.block_until_ready(unflatten(x, C, H, W))
    assert y.shape == (N, C, H, W)
    assert jnp.array_equal(y, x.reshape(N, C, H, W))

    # 2) Multi-block tiled grid (forced small block budget) on a 128-aligned K.
    N2, C2, H2, W2 = 16, 8, 32, 16  # K = 4096
    x2 = jax.random.normal(jax.random.PRNGKey(1), (N2, C2 * H2 * W2), dtype=jnp.float32)
    y2 = jax.block_until_ready(unflatten(x2, C2, H2, W2, block_bytes=64 * 1024))
    assert y2.shape == (N2, C2, H2, W2)
    assert jnp.array_equal(y2, x2.reshape(N2, C2, H2, W2))

    # 3) Module default channel/spatial dims (C=128, H=7, W=7) with small batch.
    N3, C3, H3, W3 = 2, 128, 7, 7  # K = 6272 (multiple of 128 -> natural view)
    x3 = jax.random.normal(jax.random.PRNGKey(2), (N3, C3 * H3 * W3), dtype=jnp.float32)
    y3 = jax.block_until_ready(unflatten(x3, C3, H3, W3))
    assert y3.shape == (N3, C3, H3, W3)
    assert jnp.array_equal(y3, x3.reshape(N3, C3, H3, W3))

    # 4) bf16 input: exercises the dtype-dependent (16-row) sublane alignment.
    x4 = jax.random.normal(jax.random.PRNGKey(3), (N2, C2 * H2 * W2), dtype=jnp.bfloat16)
    y4 = jax.block_until_ready(unflatten(x4, C2, H2, W2, block_bytes=64 * 1024))
    assert y4.shape == (N2, C2, H2, W2)
    assert jnp.array_equal(y4, x4.reshape(N2, C2, H2, W2))

    print("KERNEL_OK")
</pallas_src>

<mosaic_0001>
module attributes {stable_mosaic.version = 11 : i64} {
  func.func @_copy_kernel(%arg0: i32, %arg1: i32, %arg2: memref<1x128xf32, #tpu.memory_space<vmem>>, %arg3: memref<1x128xf32, #tpu.memory_space<vmem>>) attributes {dimension_semantics = [#tpu.dimension_semantics<parallel>, #tpu.dimension_semantics<parallel>], iteration_bounds = array<i64: 1, 1>, scalar_prefetch = 0 : i64, scratch_operands = 0 : i64, tpu.core_type = #tpu.core_type<tc>, window_params = [{transform_indices = @transform_0, window_bounds = array<i64: 1, 128>}, {transform_indices = @transform_1, window_bounds = array<i64: 1, 128>}]} {
    %c0 = arith.constant 0 : index
    %c0_0 = arith.constant 0 : index
    %0 = vector.load %arg2[%c0, %c0_0] : memref<1x128xf32, #tpu.memory_space<vmem>>, vector<1x128xf32>
    %c0_1 = arith.constant 0 : index
    %c0_2 = arith.constant 0 : index
    %1 = vector.load %arg3[%c0_1, %c0_2] : memref<1x128xf32, #tpu.memory_space<vmem>>, vector<1x128xf32>
    tpu.vector_store %arg3[%c0_1, %c0_2], %0 {strides = array<i32>} : memref<1x128xf32, #tpu.memory_space<vmem>>, vector<1x128xf32>,
    return
  }
  func.func @transform_0(%arg0: i32, %arg1: i32) -> (i32, i32) {
    %c0_i32 = arith.constant 0 : i32
    return %arg0, %arg1 : i32, i32
  }
  func.func @transform_1(%arg0: i32, %arg1: i32) -> (i32, i32) {
    %c0_i32 = arith.constant 0 : i32
    return %arg0, %arg1 : i32, i32
  }
}

</mosaic_0001>

<bundles_post_ra>
// kernel: tpu_custom_call.1
= control target key start
LH: loop header
LB: loop body
LE: loop exit
PB: predicated region body
PF: predicated region fallthrough
CT: control target
= control target key end

     0   :  { %6 = vsyncpa [#allocation3], 0  ;;  %s124_s0 = inlined_call_operand.hbm [shape: f32[1,128], index: 0, kind: input, shape index: {}]   ;;  %s125_s1 = inlined_call_operand.hbm [shape: f32[1,128], index: 1, kind: output, shape index: {}]  }
   0x1   :  { %7 = vsyncpa [#allocation4], 0  ;;  %s88_s6 = smov [#allocation2]   ;;  %s40_s10 = scalar_lea.hbm %s124_s0, 16 }
   0x2   :  { %s14_s7 = sshll.u32 %s88_s6, 4  ;;  %p41_p0 = scmp.ne.s32.totalorder %s124_s0, %s40_s10  ;;  %s15_s7 = int_to_ptr.vmem [resolvable:$true] %s14_s7 }
   0x3   :  { %p44_p1 = scmp.lt.u32.totalorder %s40_s10, %s124_s0 }
   0x5   :  { %p46_p2 = pnand %p44_p1, %p41_p0 }
   0x7   :  { %49 = shalt.err (!%p46_p2)
}
   0x8   :  { %s50_s15 = scalar_lea.vmem %s15_s7, 16  ;;  %s54_s16 = scalar_lea.vmem %s15_s7, 32 }
   0x9   :  { %p51_p3 = scmp.ne.s32.totalorder %s15_s7, %s50_s15  ;;  %p55_p4 = scmp.lt.s32.totalorder %s15_s7, %s15_s7 }
   0xa   :  { %p56_p5 = scmp.lt.s32.totalorder %s54_s16, %s50_s15 }
   0xc   :  { %p57_p6 = por %p56_p5, %p55_p4 }
   0xe   :  { %p58_p7 = pnand %p57_p6, %p51_p3 }
  0x10   :  { %61 = shalt.err (!%p58_p7)
}
  0x11   :  { %17 = dma.hbm_to_vmem [thread:$0]  %s124_s0, 16, %s15_s7, [#allocation3]  }
  0x12   :  { %84 = dma.done.wait [#allocation3], 16  }
  0x13   :  { %85 = vsyncadd [#allocation3], 4294967280  ;;  %s89_s19 = smov [#allocation5]   ;;  %v21_v0 = vld [vmem:[#allocation2] sm:$0x1] }
  0x14   :  { %s29_s20 = sshll.u32 %s89_s19, 4  ;;  %22 = vst [vmem:[#allocation5] sm:$0x1] %v21_v0  ;;  %s30_s20 = int_to_ptr.vmem [resolvable:$true] %s29_s20 }
  0x15   :  { %s62_s21 = scalar_lea.vmem %s30_s20, 16  ;;  %s66_s22 = scalar_lea.vmem %s30_s20, 32 }
  0x16   :  { %p63_p8 = scmp.ne.s32.totalorder %s30_s20, %s62_s21  ;;  %p67_p9 = scmp.lt.s32.totalorder %s30_s20, %s30_s20 }
  0x17   :  { %p68_p10 = scmp.lt.s32.totalorder %s66_s22, %s62_s21 }
  0x19   :  { %p69_p11 = por %p68_p10, %p67_p9 }
  0x1b   :  { %p70_p12 = pnand %p69_p11, %p63_p8 }
  0x1d   :  { %73 = shalt.err (!%p70_p12)
}
  0x1e   :  { %s74_s25 = scalar_lea.hbm %s125_s1, 16 }
  0x1f   :  { %p75_p13 = scmp.ne.s32.totalorder %s125_s1, %s74_s25  ;;  %p78_p0 = scmp.lt.u32.totalorder %s74_s25, %s125_s1 }
  0x21   :  { %p80_p1 = pnand %p78_p0, %p75_p13 }
  0x23   :  { %83 = shalt.err (!%p80_p1)
}
  0x24   :  { %32 = dma.vmem_to_hbm [thread:$0]  %s30_s20, 16, %s125_s1, [#allocation4]  }
  0x25   :  { %86 = dma.done.wait [#allocation4], 16  }
  0x26   :  { %87 = vsyncadd [#allocation4], 4294967280 }
  0x27   :  { %36 = vsyncpa [#allocation3], 1 }
  0x28   :  { %37 = vsyncpa [#allocation4], 1 }

</bundles_post_ra>
